<compile_context>
chip_gen: v6e
topology: v6e:2x2x1
jax: 0.10.0
libtpu: 0.0.40
codegen_flags: <defaults>
</compile_context>

<pallas_src>
import jax
import jax.numpy as jnp
from jax.experimental import pallas as pl
from jax.experimental.pallas import tpu as pltpu


def _pe_add_kernel(x_ref, pe_ref, o_ref):
    # x_ref/o_ref: (ts, D) when the batch dim is squeezed, or (bb, ts, D) when
    # a batch sub-block is used.  pe_ref is always (ts, D); numpy broadcasting
    # handles both cases (leading-dim broadcast is VALU-only, no relayout).
    o_ref[...] = x_ref[...] + pe_ref[...]


def make_position_encoding(model_dim: int, max_seq_len: int,
                           dtype=jnp.float32) -> jnp.ndarray:
    """Sinusoidal PE table, identical to the PyTorch __init__ (built once,
    in the activation dtype so no per-call cast is needed)."""
    positions = jnp.arange(max_seq_len, dtype=jnp.float32)[:, None]           # (L, 1)
    div_term = 1.0 / jnp.power(
        10000.0, jnp.arange(0, model_dim, 2, dtype=jnp.float32) / model_dim)  # (D/2,)
    freq = positions * div_term                                               # (L, D/2)
    pe = jnp.zeros((max_seq_len, model_dim), dtype=jnp.float32)
    pe = pe.at[:, 0::2].set(jnp.sin(freq))
    pe = pe.at[:, 1::2].set(jnp.cos(freq))
    return pe.astype(dtype)


# Minimum sublane multiple per element size (packed-dtype tiling).
_SUBLANE_BY_ITEMSIZE = {4: 8, 2: 16, 1: 32}


def _tile_target_bytes() -> int:
    """Per-generation tile-size target.

    v6e/v7x: 32 MiB scoped-VMEM default -> ~4 MiB tiles (~6 live buffers ~= 24 MiB).
    v5e:     16 MiB scoped-VMEM default -> ~2 MiB tiles (~12 MiB live), already
             ~85% of its HBM roofline.
    Unknown / no device info: conservative 2 MiB.
    """
    try:
        kind = jax.devices()[0].device_kind.lower()
    except Exception:  # pragma: no cover - defensive fallback
        return 2 << 20
    if "v5" in kind:
        return 2 << 20
    if "v6" in kind or "v7" in kind:
        return 4 << 20
    return 2 << 20


def _choose_seq_tile(S: int, D: int, dtype, target_tile_bytes: int,
                     max_rows: int = 4096) -> int:
    """Fixed seq-tile size: ~target_tile_bytes per (ts, D) tile, ts a multiple
    of the dtype's sublane packing, clamped to at most S (full-dim blocks are
    always legal).  Used with a cdiv grid, so ts need not divide S."""
    itemsize = jnp.dtype(dtype).itemsize
    align = _SUBLANE_BY_ITEMSIZE.get(itemsize, 8)
    row_bytes = max(1, D * itemsize)
    rows = max(align, min(max_rows, target_tile_bytes // row_bytes))
    rows = max(align, (rows // align) * align)   # align down to sublane multiple
    # Clamp: either ts is a sublane multiple <= S (partial last tile is masked)
    # or ts == S (full-dim block, always legal).
    return min(rows, S)


def _choose_batch_block(B: int, tile_bytes: int, target_tile_bytes: int) -> int:
    """Batch sub-block: only when a single (ts, D) tile is far below the
    target (small D / short S).  Restricted to divisors of B."""
    if tile_bytes >= target_tile_bytes:
        return 1
    want = max(1, target_tile_bytes // max(1, tile_bytes))
    for cand in range(min(B, want), 0, -1):
        if B % cand == 0:
            return cand
    return 1


def positional_encoding_forward(inputs: jnp.ndarray,
                                position_encoding: jnp.ndarray,
                                *, donate_inputs: bool = False) -> jnp.ndarray:
    """inputs: (B, S, D);  position_encoding: full (max_seq_len, D) table.

    The first S rows of the table are selected via the BlockSpec index_map
    (no slicing op).  Set donate_inputs=True only if the caller does not reuse
    `inputs` afterwards (aliases the output onto the input buffer).
    """
    B, S, D = inputs.shape
    max_seq_len, pe_dim = position_encoding.shape
    if S > max_seq_len:
        raise ValueError(f"seq_len {S} exceeds max_seq_len {max_seq_len}")
    if pe_dim != D:
        raise ValueError(f"model_dim mismatch: inputs {D} vs PE table {pe_dim}")
    if position_encoding.dtype != inputs.dtype:
        # Build the table in the activation dtype at init to avoid this cast.
        position_encoding = position_encoding.astype(inputs.dtype)

    itemsize = jnp.dtype(inputs.dtype).itemsize
    target = _tile_target_bytes()
    ts = _choose_seq_tile(S, D, inputs.dtype, target)
    tile_bytes = ts * D * itemsize
    bb = _choose_batch_block(B, tile_bytes, target)

    num_s_tiles = pl.cdiv(S, ts)     # partial last seq tile is masked by Pallas
    num_b_tiles = B // bb            # bb divides B

    if bb == 1:
        # Batch dim squeezed -> kernel body is a plain (ts, D) vreg-aligned add.
        x_spec = pl.BlockSpec((None, ts, D), lambda j, b: (b, j, 0))
        o_spec = pl.BlockSpec((None, ts, D), lambda j, b: (b, j, 0))
    else:
        # Batch sub-block; PE stays (ts, D) and broadcasts in the body.
        x_spec = pl.BlockSpec((bb, ts, D), lambda j, b: (b, j, 0))
        o_spec = pl.BlockSpec((bb, ts, D), lambda j, b: (b, j, 0))
    # PE block index depends only on the seq-tile axis -> not re-fetched while
    # the (innermost) batch axis varies.
    pe_spec = pl.BlockSpec((ts, D), lambda j, b: (j, 0))

    extra_kwargs = {}
    if donate_inputs:
        extra_kwargs["input_output_aliases"] = {0: 0}

    return pl.pallas_call(
        _pe_add_kernel,
        out_shape=jax.ShapeDtypeStruct((B, S, D), inputs.dtype),
        grid_spec=pltpu.PrefetchScalarGridSpec(
            num_scalar_prefetch=0,
            # Seq-tile axis outermost, batch innermost.
            grid=(num_s_tiles, num_b_tiles),
            in_specs=[x_spec, pe_spec],
            out_specs=o_spec,
        ),
        compiler_params=pltpu.CompilerParams(
            # Pure streaming add, every output block distinct -> both axes are
            # independent; lets megacore (v7x) shard the grid across its 2 TCs.
            dimension_semantics=("parallel", "parallel"),
        ),
        **extra_kwargs,
    )(inputs, position_encoding)


if __name__ == "__main__":
    # Small shapes consistent with the module's forward signature.
    # model_dim is a multiple of 128 so output stores are lane-dense.
    batch, seq_len, model_dim = 2, 8, 128
    max_seq_len = 16
    dropout_rate = 0.1  # identity in eval mode

    key = jax.random.PRNGKey(0)
    x = jax.random.normal(key, (batch, seq_len, model_dim), dtype=jnp.float32)

    # Table built once, in the activation dtype (no per-call slice/cast).
    pe_table = make_position_encoding(model_dim, max_seq_len, dtype=x.dtype)

    out = positional_encoding_forward(x, pe_table)
    out = jax.block_until_ready(out)

    # Pure-JAX reference check (eval-mode PyTorch forward).
    ref = x + pe_table[:seq_len][None, :, :]
    assert out.shape == (batch, seq_len, model_dim)
    assert jnp.allclose(out, ref, atol=1e-6, rtol=1e-6), "mismatch vs reference"

    print("KERNEL_OK")
</pallas_src>

<mosaic_0001>
module attributes {stable_mosaic.version = 11 : i64} {
  func.func @_pe_add_kernel(%arg0: i32, %arg1: i32, %arg2: memref<2x8x128xf32, #tpu.memory_space<vmem>>, %arg3: memref<8x128xf32, #tpu.memory_space<vmem>>, %arg4: memref<2x8x128xf32, #tpu.memory_space<vmem>>) attributes {dimension_semantics = [#tpu.dimension_semantics<parallel>, #tpu.dimension_semantics<parallel>], iteration_bounds = array<i64: 1, 1>, scalar_prefetch = 0 : i64, scratch_operands = 0 : i64, tpu.core_type = #tpu.core_type<tc>, window_params = [{transform_indices = @transform_0, window_bounds = array<i64: 2, 8, 128>}, {transform_indices = @transform_1, window_bounds = array<i64: 8, 128>}, {transform_indices = @transform_2, window_bounds = array<i64: 2, 8, 128>}]} {
    %c0 = arith.constant 0 : index
    %c0_0 = arith.constant 0 : index
    %c0_1 = arith.constant 0 : index
    %0 = vector.load %arg2[%c0, %c0_0, %c0_1] : memref<2x8x128xf32, #tpu.memory_space<vmem>>, vector<2x8x128xf32>
    %c0_2 = arith.constant 0 : index
    %c0_3 = arith.constant 0 : index
    %1 = vector.load %arg3[%c0_2, %c0_3] : memref<8x128xf32, #tpu.memory_space<vmem>>, vector<8x128xf32>
    %2 = vector.shape_cast %1 : vector<8x128xf32> to vector<1x8x128xf32>
    %3 = vector.broadcast %2 : vector<1x8x128xf32> to vector<2x8x128xf32>
    %4 = arith.addf %0, %3 : vector<2x8x128xf32>
    %c0_4 = arith.constant 0 : index
    %c0_5 = arith.constant 0 : index
    %c0_6 = arith.constant 0 : index
    %5 = vector.load %arg4[%c0_4, %c0_5, %c0_6] : memref<2x8x128xf32, #tpu.memory_space<vmem>>, vector<2x8x128xf32>
    tpu.vector_store %arg4[%c0_4, %c0_5, %c0_6], %4 {strides = array<i32>} : memref<2x8x128xf32, #tpu.memory_space<vmem>>, vector<2x8x128xf32>,
    return
  }
  func.func @transform_0(%arg0: i32, %arg1: i32) -> (i32, i32, i32) {
    %c0_i32 = arith.constant 0 : i32
    %c0_i32_0 = arith.constant 0 : i32
    return %arg1, %arg0, %c0_i32 : i32, i32, i32
  }
  func.func @transform_1(%arg0: i32, %arg1: i32) -> (i32, i32) {
    %c0_i32 = arith.constant 0 : i32
    %c0_i32_0 = arith.constant 0 : i32
    return %arg0, %c0_i32 : i32, i32
  }
  func.func @transform_2(%arg0: i32, %arg1: i32) -> (i32, i32, i32) {
    %c0_i32 = arith.constant 0 : i32
    %c0_i32_0 = arith.constant 0 : i32
    return %arg1, %arg0, %c0_i32 : i32, i32, i32
  }
}

</mosaic_0001>

<bundles_post_ra>
// kernel: tpu_custom_call.1
= control target key start
LH: loop header
LB: loop body
LE: loop exit
PB: predicated region body
PF: predicated region fallthrough
CT: control target
= control target key end

     0   :  { %7 = vsyncpa [#allocation3], 0  ;;  %s169_s0 = inlined_call_operand.hbm [shape: f32[2,8,128], index: 0, kind: input, shape index: {}]   ;;  %s170_s1 = inlined_call_operand.hbm [shape: f32[16,128], index: 1, kind: input, shape index: {}]   ;;  %s171_s2 = inlined_call_operand.hbm [shape: f32[2,8,128], index: 2, kind: output, shape index: {}]  }
   0x1   :  { %8 = vsyncpa [#allocation6], 0 }
   0x2   :  { %9 = vsyncpa [#allocation4], 0  ;;  %s134_s9 = smov [#allocation2]  }
   0x3   :  { %s15_s10 = sshll.u32 %s134_s9, 4  ;;  %s16_s10 = int_to_ptr.vmem [resolvable:$true] %s15_s10 }
   0x4   :  { %s76_s11 = scalar_lea.vmem %s16_s10, 256  ;;  %p81_p1 = scmp.lt.s32.totalorder %s16_s10, %s16_s10 }
   0x5   :  { %p77_p0 = scmp.ne.s32.totalorder %s16_s10, %s76_s11  ;;  %p82_p2 = scmp.lt.s32.totalorder %s76_s11, %s76_s11 }
   0x7   :  { %p83_p3 = por %p82_p2, %p81_p1 }
   0x9   :  { %p84_p4 = pnand %p83_p3, %p77_p0 }
   0xb   :  { %87 = shalt.err (!%p84_p4)
}
   0xc   :  { %s135_s12 = smov 128   ;;  %s136_s13 = smov 8  }
   0xd   :  { %21 = dma.hbm_to_vmem [thread:$0]  %s169_s0, 256, %s16_s10, [#allocation3], %s135_s12, %s135_s12, %s136_s13  }
   0xe   :  { %s137_s16 = smov [#allocation5]  }
   0xf   :  { %s28_s17 = sshll.u32 %s137_s16, 4  ;;  %s29_s17 = int_to_ptr.vmem [resolvable:$true] %s28_s17 }
  0x10   :  { %s96_s18 = scalar_lea.vmem %s29_s17, 128  ;;  %p101_p6 = scmp.lt.s32.totalorder %s29_s17, %s29_s17 }
  0x11   :  { %p97_p5 = scmp.ne.s32.totalorder %s29_s17, %s96_s18  ;;  %p102_p7 = scmp.lt.s32.totalorder %s96_s18, %s96_s18 }
  0x13   :  { %p103_p8 = por %p102_p7, %p101_p6 }
  0x15   :  { %p104_p9 = pnand %p103_p8, %p97_p5 }
  0x17   :  { %107 = shalt.err (!%p104_p9)
}
  0x18   :  { %31 = dma.hbm_to_vmem [thread:$0]  %s170_s1, 128, %s29_s17, [#allocation6]  }
  0x19   :  { %128 = dma.done.wait [#allocation3], 256  }
  0x1a   :  { %129 = vsyncadd [#allocation3], 4294967040 }
  0x1b   :  { %130 = dma.done.wait [#allocation6], 128  }
  0x1c   :  { %131 = vsyncadd [#allocation6], 4294967168  ;;  %s138_s21 = smov [#allocation7]   ;;  %v38_v0 = vld [vmem:[#allocation2] sm:$0xff]  ;;  %v40_v1 = vld [vmem:[#allocation5] sm:$0xff] }
  0x1d   :  { %s50_s0 = sshll.u32 %s138_s21, 4  ;;  %v39_v2 = vld [vmem:[#allocation2 + $0x8] sm:$0xff]  ;;  %v41_v3 = vadd.f32 %v40_v1, %v38_v0  ;;  %s51_s0 = int_to_ptr.vmem [resolvable:$true] %s50_s0 }
  0x1e   :  { %v42_v4 = vadd.f32 %v40_v1, %v39_v2  ;;  %s108_s22 = scalar_lea.vmem %s51_s0, 256  ;;  %p113_p11 = scmp.lt.s32.totalorder %s51_s0, %s51_s0 }
  0x1f   :  { %43 = vst [vmem:[#allocation7] sm:$0xff] %v41_v3  ;;  %p109_p10 = scmp.ne.s32.totalorder %s51_s0, %s108_s22  ;;  %p114_p12 = scmp.lt.s32.totalorder %s108_s22, %s108_s22 }
  0x20   :  { %44 = vst [vmem:[#allocation7 + $0x8] sm:$0xff] %v42_v4 }
  0x21   :  { %p115_p13 = por %p114_p12, %p113_p11 }
  0x23   :  { %p116_p0 = pnand %p115_p13, %p109_p10 }
  0x25   :  { %119 = shalt.err (!%p116_p0)
}
  0x26   :  { %56 = dma.vmem_to_hbm [thread:$0]  %s51_s0, 256, %s171_s2, [#allocation4], %s135_s12, %s135_s12, %s136_s13  }
  0x27   :  { %132 = dma.done.wait [#allocation4], 256  }
  0x28   :  { %133 = vsyncadd [#allocation4], 4294967040 }
  0x29   :  { %60 = vsyncpa [#allocation3], 1 }
  0x2a   :  { %61 = vsyncpa [#allocation6], 1 }
  0x2b   :  { %62 = vsyncpa [#allocation4], 1 }

</bundles_post_ra>
